<compile_context>
chip_gen: v7x
topology: tpu7x:2x2x1
jax: 0.10.0
libtpu: 0.0.40
codegen_flags: <defaults>
</compile_context>

<pallas_src>
import functools
import math

import jax
import jax.numpy as jnp
from jax.experimental import pallas as pl
from jax.experimental.pallas import tpu as pltpu

LANE = 128
SUBLANE = 8
LEAKY_SLOPE = 0.01  # PyTorch nn.LeakyReLU default


def _round_up(x, m):
    return (x + m - 1) // m * m


# ---------------------------------------------------------------------------
# Fused kernel: loops over all layers with the activation resident in VMEM.
# ---------------------------------------------------------------------------
def _mlp_fused_kernel(x_ref, w_ref, b_ref, *out_refs, acts, slope, collect):
    # x_ref : (tm, Dp)           current batch tile (padded)
    # w_ref : (L, Dp, Dp)        all layer weights, (in, out) layout, zero-padded
    # b_ref : (L, 1, Dp)         all layer biases, zero-padded
    # out_refs[0] : (tm, Dp)     final layer output
    # out_refs[1] : (L, tm, Dp)  per-layer activations (only when collect=True)
    o_ref = out_refs[0]
    zs_ref = out_refs[1] if collect else None

    z = x_ref[...].astype(jnp.float32)
    for l, act in enumerate(acts):            # static unrolled loop over layers
        y = jnp.dot(z, w_ref[l], preferred_element_type=jnp.float32) + b_ref[l]
        if act:
            y = jnp.where(y > 0, y, slope * y)
        if collect:
            zs_ref[l, ...] = y.astype(zs_ref.dtype)
        z = y
    o_ref[...] = z.astype(o_ref.dtype)


def _mlp_pallas(x_pad, w_stack, b_stack, acts, collect, tm):
    Bp, Dp = x_pad.shape
    L = w_stack.shape[0]
    grid = (Bp // tm,)

    kernel = functools.partial(
        _mlp_fused_kernel, acts=tuple(bool(a) for a in acts),
        slope=LEAKY_SLOPE, collect=collect,
    )

    out_shape = [jax.ShapeDtypeStruct((Bp, Dp), x_pad.dtype)]
    out_specs = [pl.BlockSpec((tm, Dp), lambda i: (i, 0))]
    if collect:
        out_shape.append(jax.ShapeDtypeStruct((L, Bp, Dp), x_pad.dtype))
        out_specs.append(pl.BlockSpec((L, tm, Dp), lambda i: (0, i, 0)))

    outs = pl.pallas_call(
        kernel,
        out_shape=tuple(out_shape),
        grid=grid,
        in_specs=[
            pl.BlockSpec((tm, Dp), lambda i: (i, 0)),        # batch tile
            pl.BlockSpec((L, Dp, Dp), lambda i: (0, 0, 0)),  # all weights (VMEM-resident)
            pl.BlockSpec((L, 1, Dp), lambda i: (0, 0, 0)),   # all biases
        ],
        out_specs=tuple(out_specs),
        compiler_params=pltpu.CompilerParams(
            dimension_semantics=("parallel",),  # batch tiles shard across TCs (v7x)
        ),
    )(x_pad, w_stack, b_stack)
    return outs


# ---------------------------------------------------------------------------
# MLP parameter construction (deterministic, PyTorch-like uniform init)
# ---------------------------------------------------------------------------
def init_mlp_params(key, in_features, hidden_features, hidden_layers, out_features):
    """Returns list of (W_transposed (Din,Dout), b (Dout,), apply_leaky) per layer."""
    if hidden_layers == 0:
        dims = [(in_features, out_features, False)]
    else:
        dims = [(in_features, hidden_features, True)]
        dims += [(hidden_features, hidden_features, True) for _ in range(hidden_layers - 1)]
        dims += [(hidden_features, out_features, False)]

    params = []
    for (din, dout, act) in dims:
        key, kw, kb = jax.random.split(key, 3)
        bound = 1.0 / math.sqrt(din)
        w = jax.random.uniform(kw, (dout, din), jnp.float32, -bound, bound)  # torch layout
        b = jax.random.uniform(kb, (dout,), jnp.float32, -bound, bound)
        params.append((w.T, b, act))  # store weight pre-transposed (Din, Dout)
    return params


# ---------------------------------------------------------------------------
# Forward pass mirroring MLP.forward
# ---------------------------------------------------------------------------
def mlp_forward(params, x, return_layers=False):
    """Mirrors MLP.forward: returns (y, zs)."""
    L = len(params)
    hidden_layers = L - 1
    acts = [p[2] for p in params]
    in_dim = params[0][0].shape[0]
    out_dims = [p[0].shape[1] for p in params]
    B = x.shape[0]

    # Lane-dense padding: one common padded feature width for all layers.
    Dp = _round_up(max([in_dim] + out_dims), LANE)
    tm = 128 if B >= 128 else _round_up(B, SUBLANE)
    Bp = _round_up(B, tm)

    # Zero-pad & stack parameters (zeros keep padded rows/cols exactly zero
    # through every layer, so numerics match the unpadded reference).
    w_stack = jnp.stack(
        [jnp.pad(w, ((0, Dp - w.shape[0]), (0, Dp - w.shape[1]))) for (w, _, _) in params]
    )
    b_stack = jnp.stack(
        [jnp.pad(b, (0, Dp - b.shape[0])).reshape(1, Dp) for (_, b, _) in params]
    )
    x_pad = jnp.pad(x.astype(jnp.float32), ((0, Bp - B), (0, Dp - in_dim)))

    collect = bool(return_layers) and hidden_layers != 0
    outs = _mlp_pallas(x_pad, w_stack, b_stack, acts, collect, tm)

    y = outs[0][:B, : out_dims[-1]]
    if not collect:
        return y, []
    zs_stack = outs[1]
    # PyTorch returns all-but-last layer outputs, detached.
    zs = [jax.lax.stop_gradient(zs_stack[l, :B, : out_dims[l]]) for l in range(L - 1)]
    return y, zs


# ---------------------------------------------------------------------------
# Pure-JAX reference for correctness checking.
# ---------------------------------------------------------------------------
def ref_forward(params, x, return_layers=False):
    z = x
    zs = []
    for (w_t, b, act) in params:
        z = z @ w_t + b
        if act:
            z = jnp.where(z > 0, z, LEAKY_SLOPE * z)
        zs.append(z)
    if not return_layers or len(params) == 1:
        return z, []
    return z, zs[:-1]


# ---------------------------------------------------------------------------
if __name__ == "__main__":
    key = jax.random.PRNGKey(0)
    key, kx = jax.random.split(key)

    batch = 8
    in_features = 16
    hidden_features = 32
    hidden_layers = 2
    out_features = 8

    x = jax.random.normal(kx, (batch, in_features), jnp.float32)
    params = init_mlp_params(key, in_features, hidden_features, hidden_layers, out_features)

    # Fast path: single fused kernel, only final output written to HBM.
    y, zs = mlp_forward(params, x, return_layers=False)
    y = jax.block_until_ready(y)

    y_ref, _ = ref_forward(params, x)
    assert y.shape == (batch, out_features)
    assert jnp.allclose(y, y_ref, atol=1e-4, rtol=1e-4), "final output mismatch"
    assert zs == []

    # return_layers path: fused kernel also emits per-layer activations.
    y2, zs2 = mlp_forward(params, x, return_layers=True)
    jax.block_until_ready(y2)
    y2_ref, zs2_ref = ref_forward(params, x, return_layers=True)
    assert jnp.allclose(y2, y2_ref, atol=1e-4, rtol=1e-4)
    assert len(zs2) == hidden_layers
    for z_got, z_ref in zip(zs2, zs2_ref):
        assert z_got.shape == z_ref.shape
        assert jnp.allclose(z_got, z_ref, atol=1e-4, rtol=1e-4), "hidden activation mismatch"

    # hidden_layers == 0 degenerate path (single Linear, no activation).
    params0 = init_mlp_params(key, in_features, hidden_features, 0, out_features)
    y0, zs0 = mlp_forward(params0, x, return_layers=True)
    jax.block_until_ready(y0)
    y0_ref, _ = ref_forward(params0, x)
    assert jnp.allclose(y0, y0_ref, atol=1e-4, rtol=1e-4)
    assert zs0 == []

    print("KERNEL_OK")
</pallas_src>

<mosaic_0001>
module attributes {stable_mosaic.version = 11 : i64} {
  func.func @_mlp_fused_kernel(%arg0: i32, %arg1: memref<8x128xf32, #tpu.memory_space<vmem>>, %arg2: memref<3x128x128xf32, #tpu.memory_space<vmem>>, %arg3: memref<3x1x128xf32, #tpu.memory_space<vmem>>, %arg4: memref<8x128xf32, #tpu.memory_space<vmem>>) attributes {dimension_semantics = [#tpu.dimension_semantics<parallel>], iteration_bounds = array<i64: 1>, scalar_prefetch = 0 : i64, scratch_operands = 0 : i64, tpu.core_type = #tpu.core_type<tc>, window_params = [{transform_indices = @transform_0, window_bounds = array<i64: 8, 128>}, {pipeline_mode = #tpu.pipeline_mode<synchronous>, transform_indices = @transform_1, window_bounds = array<i64: 3, 128, 128>}, {pipeline_mode = #tpu.pipeline_mode<synchronous>, transform_indices = @transform_2, window_bounds = array<i64: 3, 1, 128>}, {transform_indices = @transform_3, window_bounds = array<i64: 8, 128>}]} {
    %c0 = arith.constant 0 : index
    %c0_0 = arith.constant 0 : index
    %0 = vector.load %arg1[%c0, %c0_0] : memref<8x128xf32, #tpu.memory_space<vmem>>, vector<8x128xf32>
    %c0_1 = arith.constant 0 : index
    %c0_2 = arith.constant 0 : index
    %c0_3 = arith.constant 0 : index
    %1 = vector.load %arg2[%c0_1, %c0_2, %c0_3] : memref<3x128x128xf32, #tpu.memory_space<vmem>>, vector<1x128x128xf32>
    %2 = vector.shape_cast %1 : vector<1x128x128xf32> to vector<128x128xf32>
    %cst = arith.constant dense<0.000000e+00> : vector<8x128xf32>
    %3 = tpu.matmul %0, %2, %cst {dimension_numbers = #tpu.dot_dimension_numbers<[1], [0], [0], [1], [0, 0, 1, 1], [], []>} : vector<8x128xf32>, vector<128x128xf32>, vector<8x128xf32> -> vector<8x128xf32>
    %c0_4 = arith.constant 0 : index
    %c0_5 = arith.constant 0 : index
    %c0_6 = arith.constant 0 : index
    %4 = vector.load %arg3[%c0_4, %c0_5, %c0_6] : memref<3x1x128xf32, #tpu.memory_space<vmem>>, vector<1x1x128xf32>
    %5 = vector.shape_cast %4 : vector<1x1x128xf32> to vector<1x128xf32>
    %6 = vector.broadcast %5 : vector<1x128xf32> to vector<8x128xf32>
    %7 = arith.addf %3, %6 : vector<8x128xf32>
    %cst_7 = arith.constant 0.000000e+00 : f32
    %8 = vector.broadcast %cst_7 : f32 to vector<8x128xf32>
    %9 = arith.cmpf ogt, %7, %8 : vector<8x128xf32>
    %cst_8 = arith.constant 0.00999999977 : f32
    %10 = vector.broadcast %cst_8 : f32 to vector<8x128xf32>
    %11 = arith.mulf %10, %7 : vector<8x128xf32>
    %12 = arith.select %9, %7, %11 : vector<8x128xi1>, vector<8x128xf32>
    %c1 = arith.constant 1 : index
    %c0_9 = arith.constant 0 : index
    %c0_10 = arith.constant 0 : index
    %13 = vector.load %arg2[%c1, %c0_9, %c0_10] : memref<3x128x128xf32, #tpu.memory_space<vmem>>, vector<1x128x128xf32>
    %14 = vector.shape_cast %13 : vector<1x128x128xf32> to vector<128x128xf32>
    %cst_11 = arith.constant dense<0.000000e+00> : vector<8x128xf32>
    %15 = tpu.matmul %12, %14, %cst_11 {dimension_numbers = #tpu.dot_dimension_numbers<[1], [0], [0], [1], [0, 0, 1, 1], [], []>} : vector<8x128xf32>, vector<128x128xf32>, vector<8x128xf32> -> vector<8x128xf32>
    %c1_12 = arith.constant 1 : index
    %c0_13 = arith.constant 0 : index
    %c0_14 = arith.constant 0 : index
    %16 = vector.load %arg3[%c1_12, %c0_13, %c0_14] : memref<3x1x128xf32, #tpu.memory_space<vmem>>, vector<1x1x128xf32>
    %17 = vector.shape_cast %16 : vector<1x1x128xf32> to vector<1x128xf32>
    %18 = vector.broadcast %17 : vector<1x128xf32> to vector<8x128xf32>
    %19 = arith.addf %15, %18 : vector<8x128xf32>
    %cst_15 = arith.constant 0.000000e+00 : f32
    %20 = vector.broadcast %cst_15 : f32 to vector<8x128xf32>
    %21 = arith.cmpf ogt, %19, %20 : vector<8x128xf32>
    %cst_16 = arith.constant 0.00999999977 : f32
    %22 = vector.broadcast %cst_16 : f32 to vector<8x128xf32>
    %23 = arith.mulf %22, %19 : vector<8x128xf32>
    %24 = arith.select %21, %19, %23 : vector<8x128xi1>, vector<8x128xf32>
    %c2 = arith.constant 2 : index
    %c0_17 = arith.constant 0 : index
    %c0_18 = arith.constant 0 : index
    %25 = vector.load %arg2[%c2, %c0_17, %c0_18] : memref<3x128x128xf32, #tpu.memory_space<vmem>>, vector<1x128x128xf32>
    %26 = vector.shape_cast %25 : vector<1x128x128xf32> to vector<128x128xf32>
    %cst_19 = arith.constant dense<0.000000e+00> : vector<8x128xf32>
    %27 = tpu.matmul %24, %26, %cst_19 {dimension_numbers = #tpu.dot_dimension_numbers<[1], [0], [0], [1], [0, 0, 1, 1], [], []>} : vector<8x128xf32>, vector<128x128xf32>, vector<8x128xf32> -> vector<8x128xf32>
    %c2_20 = arith.constant 2 : index
    %c0_21 = arith.constant 0 : index
    %c0_22 = arith.constant 0 : index
    %28 = vector.load %arg3[%c2_20, %c0_21, %c0_22] : memref<3x1x128xf32, #tpu.memory_space<vmem>>, vector<1x1x128xf32>
    %29 = vector.shape_cast %28 : vector<1x1x128xf32> to vector<1x128xf32>
    %30 = vector.broadcast %29 : vector<1x128xf32> to vector<8x128xf32>
    %31 = arith.addf %27, %30 : vector<8x128xf32>
    %c0_23 = arith.constant 0 : index
    %c0_24 = arith.constant 0 : index
    %32 = vector.load %arg4[%c0_23, %c0_24] : memref<8x128xf32, #tpu.memory_space<vmem>>, vector<8x128xf32>
    tpu.vector_store %arg4[%c0_23, %c0_24], %31 {strides = array<i32>} : memref<8x128xf32, #tpu.memory_space<vmem>>, vector<8x128xf32>,
    return
  }
  func.func @transform_0(%arg0: i32) -> (i32, i32) {
    %c0_i32 = arith.constant 0 : i32
    %c0_i32_0 = arith.constant 0 : i32
    return %arg0, %c0_i32 : i32, i32
  }
  func.func @transform_1(%arg0: i32) -> (i32, i32, i32) {
    %c0_i32 = arith.constant 0 : i32
    %c0_i32_0 = arith.constant 0 : i32
    %c0_i32_1 = arith.constant 0 : i32
    %c0_i32_2 = arith.constant 0 : i32
    return %c0_i32, %c0_i32_0, %c0_i32_1 : i32, i32, i32
  }
  func.func @transform_2(%arg0: i32) -> (i32, i32, i32) {
    %c0_i32 = arith.constant 0 : i32
    %c0_i32_0 = arith.constant 0 : i32
    %c0_i32_1 = arith.constant 0 : i32
    %c0_i32_2 = arith.constant 0 : i32
    return %c0_i32, %c0_i32_0, %c0_i32_1 : i32, i32, i32
  }
  func.func @transform_3(%arg0: i32) -> (i32, i32) {
    %c0_i32 = arith.constant 0 : i32
    %c0_i32_0 = arith.constant 0 : i32
    return %arg0, %c0_i32 : i32, i32
  }
}

</mosaic_0001>

<bundles_post_ra>
// kernel: tpu_custom_call.1
= control target key start
LH: loop header
LB: loop body
LE: loop exit
PB: predicated region body
PF: predicated region fallthrough
CT: control target
= control target key end

     0   :  { %8 = vsyncpa [#allocation3], 0  ;;  %s771_s0 = inlined_call_operand.hbm [shape: f32[8,128], index: 0, kind: input, shape index: {}]   ;;  %s772_s1 = inlined_call_operand.hbm [shape: f32[3,128,128], index: 1, kind: input, shape index: {}]   ;;  %s773_s2 = inlined_call_operand.vmem [shape: f32[3,1,128], index: 2, kind: input, shape index: {}]   ;;  %s774_s3 = inlined_call_operand.hbm [shape: f32[8,128], index: 3, kind: output, shape index: {}]  }
   0x1   :  { %9 = vsyncpa [#allocation6], 0 }
   0x2   :  { %10 = vsyncpa [#allocation4], 0  ;;  %s661_s12 = smov [#allocation2]   ;;  %s662_s14 = smov [#allocation5]  }
   0x3   :  { %s17_s13 = sshll.u32 %s661_s12, 4  ;;  %s26_s15 = sshll.u32 %s662_s14, 4  ;;  %s18_s13 = int_to_ptr.vmem [resolvable:$true] %s17_s13  ;;  %s689_s15 = int_to_ptr.vmem [resolvable:$true] %s26_s15 }
   0x4   :  { %s589_s18 = scalar_lea.hbm %s771_s0, 128 }
   0x5   :  { %p590_p0 = scmp.ne.s32.totalorder %s771_s0, %s589_s18  ;;  %p593_p1 = scmp.lt.u32.totalorder %s589_s18, %s771_s0 }
   0x7   :  { %p595_p2 = pnand %p593_p1, %p590_p0 }
   0x9   :  { %598 = shalt.err (!%p595_p2)
}
   0xa   :  { %s599_s23 = scalar_lea.vmem %s18_s13, 128  ;;  %p604_p4 = scmp.lt.s32.totalorder %s18_s13, %s18_s13 }
   0xb   :  { %p600_p3 = scmp.ne.s32.totalorder %s18_s13, %s599_s23  ;;  %p605_p5 = scmp.lt.s32.totalorder %s599_s23, %s599_s23 }
   0xd   :  { %p606_p6 = por %p605_p5, %p604_p4 }
   0xf   :  { %p607_p7 = pnand %p606_p6, %p600_p3 }
  0x11   :  { %610 = shalt.err (!%p607_p7)
}
  0x12   :  { %20 = dma.hbm_to_vmem [thread:$0]  %s771_s0, 128, %s18_s13, [#allocation3]  }
  0x13   :  { %s611_s28 = scalar_lea.hbm %s772_s1, 6144 }
  0x14   :  { %p612_p8 = scmp.ne.s32.totalorder %s772_s1, %s611_s28  ;;  %p615_p9 = scmp.lt.u32.totalorder %s611_s28, %s772_s1 }
  0x16   :  { %p617_p10 = pnand %p615_p9, %p612_p8 }
  0x18   :  { %620 = shalt.err (!%p617_p10)
}
  0x19   :  { %s621_s6 = scalar_lea.vmem %s689_s15, 6144  ;;  %p626_p12 = scmp.lt.s32.totalorder %s689_s15, %s689_s15 }
  0x1a   :  { %p622_p11 = scmp.ne.s32.totalorder %s689_s15, %s621_s6  ;;  %p627_p13 = scmp.lt.s32.totalorder %s621_s6, %s621_s6 }
  0x1c   :  { %p628_p0 = por %p627_p13, %p626_p12 }
  0x1e   :  { %p629_p1 = pnand %p628_p0, %p622_p11 }
  0x20   :  { %632 = shalt.err (!%p629_p1)
}
  0x21   :  { %s663_s0 = smov 128   ;;  %s664_s7 = smov 8  }
  0x22   :  { %32 = dma.hbm_to_vmem [thread:$0]  %s772_s1, 6144, %s689_s15, [#allocation6], %s663_s0, %s663_s0, %s664_s7  }
  0x23   :  { %655 = dma.done.wait [#allocation3], 128  }
  0x24   :  { %656 = vsyncadd [#allocation3], 4294967168 }
  0x25   :  { %657 = dma.done.wait [#allocation6], 6144  }
  0x26   :  { %658 = vsyncadd [#allocation6], 4294961152  ;;  %v665_v0 = vmov 0.0|0.0   ;;  %vm666_vm0 = vmmov 0   ;;  %v667_v1 = vmov 0.0   ;;  %v42_v2 = vld [vmem:[#allocation5] sm:$0xff] }
  0x27   :  { %509 = vmatprep.subr.bf16.mxu0 %v665_v0  ;;  %436 = vmatprep.mubr.msk.f32.mxu0 %vm666_vm0, %v667_v1  ;;  %v43_v3 = vld [vmem:[#allocation5 + $0x8] sm:$0xff]  ;;  %v44_v4 = vld [vmem:[#allocation5 + $0x10] sm:$0xff]  ;;  %v45_v6 = vld [vmem:[#allocation5 + $0x18] sm:$0xff]  ;;  %s668_s15 = smov [#allocation7]  }
  0x28   :  { %533 = vmatprep.subr.bf16.mxu1 %v665_v0  ;;  %471 = vmatprep.mubr.msk.f32.mxu1 %vm666_vm0, %v667_v1  ;;  %v510_v5 = vpack.c.bf16 %v43_v3, %v42_v2  ;;  %v513_v7 = vpack.c.bf16 %v45_v6, %v44_v4  ;;  %v46_v8 = vld [vmem:[#allocation5 + $0x20] sm:$0xff]  ;;  %v47_v9 = vld [vmem:[#allocation5 + $0x28] sm:$0xff]  ;;  %v141_v12 = vld [vmem:[#allocation5 + $0x90] sm:$0xff]  ;;  %s338_s16 = sshll.u32 %s668_s15, 4  ;;  %s339_s16 = int_to_ptr.vmem [resolvable:$true] %s338_s16 }
  0x29   :  { %v139_v10 = vld [vmem:[#allocation5 + $0x80] sm:$0xff]  ;;  %v140_v11 = vld [vmem:[#allocation5 + $0x88] sm:$0xff]  ;;  %v142_v13 = vld [vmem:[#allocation5 + $0x98] sm:$0xff]  ;;  %v516_v14 = vpack.c.bf16 %v47_v9, %v46_v8  ;;  %s633_s17 = scalar_lea.vmem %s339_s16, 128  ;;  %p638_p3 = scmp.lt.s32.totalorder %s339_s16, %s339_s16 }
  0x2a   :  { %511 = vmatpush3.bf16.msra.mxu0 %v510_v5  ;;  %v534_v15 = vpack.c.bf16 %v140_v11, %v139_v10  ;;  %v48_v16 = vld [vmem:[#allocation5 + $0x30] sm:$0xff]  ;;  %v49_v17 = vld [vmem:[#allocation5 + $0x38] sm:$0xff]  ;;  %v537_v18 = vpack.c.bf16 %v142_v13, %v141_v12  ;;  %v143_v19 = vld [vmem:[#allocation5 + $0xa0] sm:$0xff]  ;;  %p634_p2 = scmp.ne.s32.totalorder %s339_s16, %s633_s17  ;;  %p639_p4 = scmp.lt.s32.totalorder %s633_s17, %s633_s17 }
  0x2b   :  { %512 = vmatprep.subr.bf16.mxu0 %v665_v0  ;;  %v144_v20 = vld [vmem:[#allocation5 + $0xa8] sm:$0xff]  ;;  %v519_v21 = vpack.c.bf16 %v49_v17, %v48_v16  ;;  %v50_v22 = vld [vmem:[#allocation5 + $0x40] sm:$0xff]  ;;  %v145_v25 = vld [vmem:[#allocation5 + $0xb0] sm:$0xff] }
  0x2c   :  { %535 = vmatpush3.bf16.msra.mxu1 %v534_v15  ;;  %v51_v23 = vld [vmem:[#allocation5 + $0x48] sm:$0xff]  ;;  %v540_v24 = vpack.c.bf16 %v144_v20, %v143_v19  ;;  %v146_v26 = vld [vmem:[#allocation5 + $0xb8] sm:$0xff]  ;;  %v52_v28 = vld [vmem:[#allocation5 + $0x50] sm:$0xff]  ;;  %p640_p5 = por %p639_p4, %p638_p3 }
  0x2d   :  { %536 = vmatprep.subr.bf16.mxu1 %v665_v0  ;;  %v522_v27 = vpack.c.bf16 %v51_v23, %v50_v22  ;;  %v53_v29 = vld [vmem:[#allocation5 + $0x58] sm:$0xff]  ;;  %v543_v30 = vpack.c.bf16 %v146_v26, %v145_v25  ;;  %v147_v31 = vld [vmem:[#allocation5 + $0xc0] sm:$0xff]  ;;  %v148_v32 = vld [vmem:[#allocation5 + $0xc8] sm:$0xff] }
  0x2e   :  { %514 = vmatpush3.bf16.msra.mxu0 %v513_v7  ;;  %v525_v33 = vpack.c.bf16 %v53_v29, %v52_v28  ;;  %v54_v34 = vld [vmem:[#allocation5 + $0x60] sm:$0xff]  ;;  %v55_v35 = vld [vmem:[#allocation5 + $0x68] sm:$0xff]  ;;  %v546_v36 = vpack.c.bf16 %v148_v32, %v147_v31  ;;  %v149_v37 = vld [vmem:[#allocation5 + $0xd0] sm:$0xff]  ;;  %p641_p6 = pnand %p640_p5, %p634_p2 }
  0x2f   :  { %515 = vmatprep.subr.bf16.mxu0 %v665_v0  ;;  %v150_v38 = vld [vmem:[#allocation5 + $0xd8] sm:$0xff]  ;;  %v528_v39 = vpack.c.bf16 %v55_v35, %v54_v34  ;;  %v56_v40 = vld [vmem:[#allocation5 + $0x70] sm:$0xff]  ;;  %v151_v43 = vld [vmem:[#allocation5 + $0xe0] sm:$0xff] }
  0x30   :  { %538 = vmatpush3.bf16.msra.mxu1 %v537_v18  ;;  %v57_v41 = vld [vmem:[#allocation5 + $0x78] sm:$0xff]  ;;  %v549_v42 = vpack.c.bf16 %v150_v38, %v149_v37  ;;  %v152_v44 = vld [vmem:[#allocation5 + $0xe8] sm:$0xff]  ;;  %v153_v48 = vld [vmem:[#allocation5 + $0xf0] sm:$0xff] }
  0x31   :  { %539 = vmatprep.subr.bf16.mxu1 %v665_v0  ;;  %v531_v45 = vpack.c.bf16 %v57_v41, %v56_v40  ;;  %v552_v46 = vpack.c.bf16 %v152_v44, %v151_v43  ;;  %v41_v47 = vld [vmem:[#allocation2] sm:$0xff]  ;;  %v237_v51 = vld [vmem:[#allocation5 + $0x100] sm:$0xff]  ;;  %v238_v52 = vld [vmem:[#allocation5 + $0x108] sm:$0xff] }
  0x32   :  { %517 = vmatpush3.bf16.msra.mxu0 %v516_v14  ;;  %v154_v49 = vld [vmem:[#allocation5 + $0xf8] sm:$0xff]  ;;  %v239_v53 = vld [vmem:[#allocation5 + $0x110] sm:$0xff]  ;;  %v558_v54 = vpack.c.bf16 %v238_v52, %v237_v51  ;;  %v241_v57 = vld [vmem:[#allocation5 + $0x120] sm:$0xff] }
  0x33   :  { %518 = vmatprep.subr.bf16.mxu0 %v665_v0  ;;  %v555_v50 = vpack.c.bf16 %v154_v49, %v153_v48  ;;  %v240_v55 = vld [vmem:[#allocation5 + $0x118] sm:$0xff]  ;;  %v242_v58 = vld [vmem:[#allocation5 + $0x128] sm:$0xff]  ;;  %v243_v60 = vld [vmem:[#allocation5 + $0x130] sm:$0xff] }
  0x34   :  { %541 = vmatpush3.bf16.msra.mxu1 %v540_v24  ;;  %v561_v56 = vpack.c.bf16 %v240_v55, %v239_v53  ;;  %v564_v59 = vpack.c.bf16 %v242_v58, %v241_v57  ;;  %v244_v61 = vld [vmem:[#allocation5 + $0x138] sm:$0xff]  ;;  %v245_v63 = vld [vmem:[#allocation5 + $0x140] sm:$0xff]  ;;  %v247_v3 = vld [vmem:[#allocation5 + $0x150] sm:$0xff] }
  0x35   :  { %542 = vmatprep.subr.bf16.mxu1 %v665_v0  ;;  %v567_v62 = vpack.c.bf16 %v244_v61, %v243_v60  ;;  %v248_v4 = vld [vmem:[#allocation5 + $0x158] sm:$0xff]  ;;  %v249_v6 = vld [vmem:[#allocation5 + $0x160] sm:$0xff]  ;;  %v250_v7 = vld [vmem:[#allocation5 + $0x168] sm:$0xff] }
  0x36   :  { %520 = vmatpush3.bf16.msra.mxu0 %v519_v21  ;;  %v573_v5 = vpack.c.bf16 %v248_v4, %v247_v3  ;;  %v576_v8 = vpack.c.bf16 %v250_v7, %v249_v6  ;;  %v348_v9 = vld [vmem:[%s773_s2] ss:$0 sm:$0xff]  ;;  %v251_v15 = vld [vmem:[#allocation5 + $0x170] sm:$0xff]  ;;  %v350_v18 = vld [vmem:[%s773_s2 + $0x1] ss:$0 sm:$0xff] }
  0x37   :  { %521 = vmatprep.subr.bf16.mxu0 %v665_v0  ;;  %v252_v16 = vld [vmem:[#allocation5 + $0x178] sm:$0xff] }
  0x38   :  { %544 = vmatpush3.bf16.msra.mxu1 %v543_v30  ;;  %v579_v17 = vpack.c.bf16 %v252_v16, %v251_v15  ;;  %v352_v23 = vld [vmem:[%s773_s2 + $0x2] ss:$0 sm:$0xff] }
  0x39   :  { %545 = vmatprep.subr.bf16.mxu1 %v665_v0 }
  0x3a   :  { %523 = vmatpush3.bf16.msra.mxu0 %v522_v27 }
  0x3b   :  { %524 = vmatprep.subr.bf16.mxu0 %v665_v0 }
  0x3c   :  { %547 = vmatpush3.bf16.msra.mxu1 %v546_v36 }
  0x3d   :  { %548 = vmatprep.subr.bf16.mxu1 %v665_v0 }
  0x3e   :  { %526 = vmatpush3.bf16.msra.mxu0 %v525_v33 }
  0x3f   :  { %527 = vmatprep.subr.bf16.mxu0 %v665_v0 }
  0x40   :  { %550 = vmatpush3.bf16.msra.mxu1 %v549_v42 }
  0x41   :  { %551 = vmatprep.subr.bf16.mxu1 %v665_v0 }
  0x42   :  { %529 = vmatpush3.bf16.msra.mxu0 %v528_v39 }
  0x43   :  { %530 = vmatprep.subr.bf16.mxu0 %v665_v0 }
  0x44   :  { %553 = vmatpush3.bf16.msra.mxu1 %v552_v46 }
  0x45   :  { %554 = vmatprep.subr.bf16.mxu1 %v665_v0 }
  0x46   :  { %532 = vmatpush3.bf16.msra.mxu0 %v531_v45 }
  0x47   :  { %557 = vmatprep.subr.bf16.mxu0 %v665_v0 }
  0x48   :  { %556 = vmatpush3.bf16.msra.mxu1 %v555_v50 }
  0x49   :  { %437 = vmatmul.mubr.f32.vlgmr.msra.gmra.mrb[0].mxu0 %v41_v47 }
  0x4a   :  { %506 = vmatprep.mubr.msk.f32.mxu0 %vm666_vm0, %v667_v1  ;;  %559 = vmatpush3.bf16.msra.mxu0 %v558_v54  ;;  %v246_v1 = vld [vmem:[#allocation5 + $0x148] sm:$0xff] }
  0x4b   :  { %560 = vmatprep.subr.bf16.mxu0 %v665_v0  ;;  %v570_v2 = vpack.c.bf16 %v246_v1, %v245_v63 }
  0x4e   :  { %562 = vmatpush3.bf16.msra.mxu0 %v561_v56 }
  0x4f   :  { %563 = vmatprep.subr.bf16.mxu0 %v665_v0 }
  0x52   :  { %565 = vmatpush3.bf16.msra.mxu0 %v564_v59 }
  0x53   :  { %566 = vmatprep.subr.bf16.mxu0 %v665_v0 }
  0x56   :  { %568 = vmatpush3.bf16.msra.mxu0 %v567_v62 }
  0x57   :  { %569 = vmatprep.subr.bf16.mxu0 %v665_v0 }
  0x5a   :  { %571 = vmatpush3.bf16.msra.mxu0 %v570_v2 }
  0x5b   :  { %572 = vmatprep.subr.bf16.mxu0 %v665_v0 }
  0x5e   :  { %574 = vmatpush3.bf16.msra.mxu0 %v573_v5 }
  0x5f   :  { %575 = vmatprep.subr.bf16.mxu0 %v665_v0 }
  0x62   :  { %577 = vmatpush3.bf16.msra.mxu0 %v576_v8 }
  0x63   :  { %578 = vmatprep.subr.bf16.mxu0 %v665_v0 }
  0x66   :  { %580 = vmatpush3.bf16.msra.mxu0 %v579_v17 }
 0x11c   :  { %v131_v10 = vpop.f32.mrb[0].mxu0 }
 0x11d   :  { %v132_v11 = vadd.f32 %v348_v9, %v131_v10  ;;  %v438_v12 = vpop.f32.mrb[1].mxu0 }
 0x11f   :  { %v136_v13 = vmul.f32 0.01, %v132_v11  ;;  %vm135_vm1 = vcmp.gt.f32.partialorder %v132_v11, 0.0 }
 0x121   :  { %v137_v14 = vsel %vm135_vm1, %v132_v11, %v136_v13 }
 0x122   :  { %472 = vmatmul.mubr.f32.vlgmr.msra.gmra.mrb[0].mxu1 %v137_v14 }
 0x1f5   :  { %v229_v0 = vpop.f32.mrb[0].mxu1 }
 0x1f6   :  { %v230_v19 = vadd.f32 %v350_v18, %v229_v0  ;;  %v473_v20 = vpop.f32.mrb[1].mxu1 }
 0x1f8   :  { %vm233_vm2 = vcmp.gt.f32.partialorder %v230_v19, 0.0  ;;  %v234_v21 = vmul.f32 0.01, %v230_v19 }
 0x1fa   :  { %v235_v22 = vsel %vm233_vm2, %v230_v19, %v234_v21 }
 0x1fb   :  { %507 = vmatmul.mubr.f32.vlgmr.msra.gmra.mrb[2].mxu0 %v235_v22 }
 0x2ce   :  { %v327_v24 = vpop.f32.mrb[2].mxu0 }
 0x2cf   :  { %v328_v25 = vadd.f32 %v352_v23, %v327_v24  ;;  %v508_v26 = vpop.f32.mrb[3].mxu0 }
 0x2d1   :  { %331 = vst [vmem:[#allocation7] sm:$0xff] %v328_v25 }
 0x2d2   :  { %644 = shalt.err (!%p641_p6)
}
 0x2d3   :  { %s645_s20 = scalar_lea.hbm %s774_s3, 128 }
 0x2d4   :  { %p646_p7 = scmp.ne.s32.totalorder %s774_s3, %s645_s20  ;;  %p649_p8 = scmp.lt.u32.totalorder %s645_s20, %s774_s3 }
 0x2d6   :  { %p651_p9 = pnand %p649_p8, %p646_p7 }
 0x2d8   :  { %654 = shalt.err (!%p651_p9)
}
 0x2d9   :  { %341 = dma.vmem_to_hbm [thread:$0]  %s339_s16, 128, %s774_s3, [#allocation4]  }
 0x2da   :  { %659 = dma.done.wait [#allocation4], 128  }
 0x2db   :  { %660 = vsyncadd [#allocation4], 4294967168 }
 0x2dc   :  { %345 = vsyncpa [#allocation3], 1 }
 0x2dd   :  { %346 = vsyncpa [#allocation6], 1 }
 0x2de   :  { %347 = vsyncpa [#allocation4], 1 }

</bundles_post_ra>
